<compile_context>
chip_gen: v5e
topology: v5e:2x2
jax: 0.10.0
libtpu: 0.0.40
codegen_flags: <defaults>
</compile_context>

<pallas_src>
import functools
import math

import jax
import jax.numpy as jnp
from jax.experimental import pallas as pl
from jax.experimental.pallas import tpu as pltpu


def _vmem_capacity_bytes():
    try:
        return int(pltpu.get_tpu_info().vmem_capacity_bytes)
    except Exception:
        return 64 << 20  # conservative fallback (v7x per-TensorCore VMEM)


def _round_up(x, m):
    return (x + m - 1) // m * m


def _sublane_multiple(dtype):
    # dtype-native row packing: 8 rows (4B), 16 rows (2B), 32 rows (1B).
    return max(8, 32 // jnp.dtype(dtype).itemsize)


def _pick_block_bytes(vmem_limit, num_layers, in_itemsize, out_itemsize):
    """Largest (L, tile_n, Fc) block such that 2x input buffers + 2x output buffers
    + f32 accumulator/upcast temps stay comfortably under the VMEM limit."""
    factor = 2.0 + (2.0 * out_itemsize + 8.0) / (num_layers * in_itemsize)
    b = int(0.85 * vmem_limit / factor)
    return max(1 << 20, min(16 << 20, b))


# ---------------------------------------------------------------------------
# Kernels
# ---------------------------------------------------------------------------

def _gridless_kernel(w_ref, x_ref, o_ref, *, inv_n):
    """Whole problem resident in VMEM: one HBM read of x, fully fused.

    The full (L, N, F) f32 upcast is never materialized: per-layer sums only.
    """
    num_layers = x_ref.shape[0]
    w32 = w_ref[...].astype(jnp.float32)

    logits = []
    for l in range(num_layers):
        col_sum = jnp.sum(x_ref[l].astype(jnp.float32), axis=0, keepdims=True)  # (1, F)
        logits.append(
            jnp.sum(w32[l:l + 1, :] * col_sum, axis=1, keepdims=True) * inv_n)   # (1, 1)

    m = logits[0]
    for l in range(1, num_layers):
        m = jnp.maximum(m, logits[l])
    exps = [jnp.exp(lg - m) for lg in logits]
    denom = exps[0]
    for l in range(1, num_layers):
        denom = denom + exps[l]
    inv_denom = 1.0 / denom

    acc = x_ref[0].astype(jnp.float32) * (exps[0] * inv_denom)
    for l in range(1, num_layers):
        acc += x_ref[l].astype(jnp.float32) * (exps[l] * inv_denom)
    o_ref[...] = acc.astype(o_ref.dtype)


def _scores_kernel(w_ref, x_ref, s_ref, acc_ref, *, inv_n, rows_in_last):
    """Reduction + softmax.  grid = (n_tiles,), 'arbitrary'.

    acc_ref: persistent (L, Fc) f32 scratch holding per-layer node sums.
    The last tile may be partial: its OOB rows hold unspecified data and are
    masked out with a select (NaN-safe) before the sum.  Softmax is computed on
    the last step and written to the (L, 1) f32 output (single writeback since
    the output block index never changes).
    """
    i = pl.program_id(0)
    last = pl.num_programs(0) - 1
    tile_rows = x_ref.shape[1]

    @pl.when(i == 0)
    def _init():
        acc_ref[...] = jnp.zeros_like(acc_ref)

    @pl.when(i != last)
    def _full_tile():
        acc_ref[...] += jnp.sum(x_ref[...].astype(jnp.float32), axis=1)

    @pl.when(i == last)
    def _last_tile_and_softmax():
        x = x_ref[...].astype(jnp.float32)
        if rows_in_last != tile_rows:
            row = jax.lax.broadcasted_iota(jnp.int32, x.shape, 1)
            x = jnp.where(row < rows_in_last, x, 0.0)
        acc_ref[...] += jnp.sum(x, axis=1)

        mean = acc_ref[...] * inv_n                                       # (L, Fc)
        logits = jnp.sum(w_ref[...].astype(jnp.float32) * mean,
                         axis=1, keepdims=True)                           # (L, 1)
        m = jnp.max(logits, axis=0, keepdims=True)
        e = jnp.exp(logits - m)
        s_ref[...] = e / jnp.sum(e, axis=0, keepdims=True)


def _weighted_sum_kernel(s_ref, x_ref, o_ref):
    """Weighted sum.  grid = (n_tiles,), 'parallel' (megacore-shardable on v7x).

    s_ref lives in SMEM -> per-layer scores are scalars and splat for free on the
    VPU (no sublane broadcast, no broadcast scratch).  Garbage rows of a partial
    last input block produce garbage output rows, but Pallas clips the partial
    output-block writeback so they never reach HBM.
    """
    num_layers = x_ref.shape[0]
    acc = x_ref[0].astype(jnp.float32) * s_ref[0, 0]
    for l in range(1, num_layers):
        acc += x_ref[l].astype(jnp.float32) * s_ref[l, 0]
    o_ref[...] = acc.astype(o_ref.dtype)


# ---------------------------------------------------------------------------
# Wrapper
# ---------------------------------------------------------------------------

def message_passing_attention(attention_weights, stacked_outputs, *,
                              force_grid=False, max_block_bytes=None):
    """attention_weights: (L, F); stacked_outputs: (L, N, F) -> (N, F)."""
    L, N, F = stacked_outputs.shape
    assert attention_weights.shape == (L, F)
    out_dtype = stacked_outputs.dtype
    inv_n = 1.0 / float(N)  # mean always divides by the true N

    x = stacked_outputs
    w = attention_weights

    # Lane-density fold: pack g = 128/F node rows into the lane axis (free reshape)
    # so every vreg / DMA / store is lane-dense.  Valid because the softmax weight
    # depends only on the layer index; w is lane-tiled to match for the logits dot.
    collapsed = False
    if F < 128 and 128 % F == 0 and N % (128 // F) == 0:
        g = 128 // F
        x = x.reshape(L, N // g, g * F)
        w = jnp.tile(w, (1, g))
        collapsed = True
    _, Nc, Fc = x.shape

    in_itemsize = jnp.dtype(x.dtype).itemsize
    out_itemsize = jnp.dtype(out_dtype).itemsize

    # Generation-aware VMEM budgets (v7x: 64 MiB/TC -> ~48 MiB; v5e/v6e: -> 96 MiB).
    vmem_cap = _vmem_capacity_bytes()
    vmem_limit = min(vmem_cap - (16 << 20), 96 << 20)
    vmem_limit = max(vmem_limit, 16 << 20)

    x_bytes = L * Nc * Fc * in_itemsize
    w_bytes = L * Fc * in_itemsize
    out_bytes = Nc * Fc * out_itemsize
    f32_plane = Nc * Fc * 4
    # Gridless working set: x + w + out resident, f32 accumulator + a couple of
    # per-layer upcast temporaries (full (L,N,F) f32 upcast is never bound).
    gridless_bytes = x_bytes + w_bytes + out_bytes + 4 * f32_plane + L * Fc * 4

    if (not force_grid) and gridless_bytes <= vmem_limit - (4 << 20):
        # One HBM read of x, everything fused, no grid overhead.
        out_c = pl.pallas_call(
            functools.partial(_gridless_kernel, inv_n=inv_n),
            out_shape=jax.ShapeDtypeStruct((Nc, Fc), out_dtype),
            compiler_params=pltpu.CompilerParams(vmem_limit_bytes=vmem_limit),
        )(w, x)
    else:
        # Tiled path: two calls (reduction+softmax, then parallel weighted sum).
        if max_block_bytes is None:
            max_block_bytes = _pick_block_bytes(vmem_limit, L, in_itemsize, out_itemsize)
        sub = _sublane_multiple(x.dtype)
        row_bytes = max(1, L * Fc * in_itemsize)
        cap = max(sub, (max_block_bytes // row_bytes) // sub * sub)
        tile_n = min(cap, _round_up(Nc, sub))
        n_tiles = pl.cdiv(Nc, tile_n)
        rows_in_last = Nc - (n_tiles - 1) * tile_n

        scores = pl.pallas_call(
            functools.partial(_scores_kernel, inv_n=inv_n, rows_in_last=rows_in_last),
            out_shape=jax.ShapeDtypeStruct((L, 1), jnp.float32),
            grid_spec=pltpu.PrefetchScalarGridSpec(
                num_scalar_prefetch=0,
                grid=(n_tiles,),
                in_specs=[
                    pl.BlockSpec((L, Fc), lambda i: (0, 0)),
                    pl.BlockSpec((L, tile_n, Fc), lambda i: (0, i, 0)),
                ],
                out_specs=pl.BlockSpec((L, 1), lambda i: (0, 0)),
                scratch_shapes=[pltpu.VMEM((L, Fc), jnp.float32)],
            ),
            compiler_params=pltpu.CompilerParams(
                dimension_semantics=("arbitrary",),
                vmem_limit_bytes=vmem_limit),
            cost_estimate=pl.CostEstimate(
                flops=2 * L * Nc * Fc,
                transcendentals=L,
                bytes_accessed=x_bytes + w_bytes + L * 4),
        )(w, x)

        out_c = pl.pallas_call(
            _weighted_sum_kernel,
            out_shape=jax.ShapeDtypeStruct((Nc, Fc), out_dtype),
            grid_spec=pltpu.PrefetchScalarGridSpec(
                num_scalar_prefetch=0,
                grid=(n_tiles,),
                in_specs=[
                    pl.BlockSpec(memory_space=pltpu.MemorySpace.SMEM),     # scores (L,1)
                    pl.BlockSpec((L, tile_n, Fc), lambda i: (0, i, 0)),
                ],
                out_specs=pl.BlockSpec((tile_n, Fc), lambda i: (i, 0)),
            ),
            compiler_params=pltpu.CompilerParams(
                dimension_semantics=("parallel",),
                vmem_limit_bytes=vmem_limit),
            cost_estimate=pl.CostEstimate(
                flops=2 * L * Nc * Fc,
                transcendentals=0,
                bytes_accessed=x_bytes + out_bytes + L * 4),
        )(scores, x)

    if collapsed:
        return out_c.reshape(N, F)
    return out_c


# ---------------------------------------------------------------------------
# Demo / self-test
# ---------------------------------------------------------------------------

if __name__ == "__main__":
    num_layers, N, feature_dim = 4, 16, 32

    key = jax.random.PRNGKey(0)
    kw, kx = jax.random.split(key)

    # Deterministic xavier_uniform-style init for attention_weights (L, F).
    bound = math.sqrt(6.0 / (num_layers + feature_dim))
    attention_weights = jax.random.uniform(
        kw, (num_layers, feature_dim), jnp.float32, -bound, bound)

    def make_stack(base_key, n_nodes, offset=0):
        return jnp.stack([
            jax.random.normal(jax.random.fold_in(base_key, offset + l),
                              (n_nodes, feature_dim), jnp.float32)
            for l in range(num_layers)], axis=0)

    def reference(w, x):
        mean = x.mean(axis=1)
        logits = jnp.einsum("ld,ld->l", w, mean)
        scores = jax.nn.softmax(logits, axis=0)
        return jnp.einsum("l,lnf->nf", scores, x)

    # Path 1: module-sized input -> gridless fused kernel (whole problem in VMEM).
    stacked = make_stack(kx, N)
    out = jax.block_until_ready(message_passing_attention(attention_weights, stacked))
    ref = reference(attention_weights, stacked)
    assert out.shape == (N, feature_dim)
    assert jnp.allclose(out, ref, atol=1e-5, rtol=1e-5)

    # Path 2: tiled two-call path (forced), lane-collapsed, ragged last tile
    # (Nc=20 with tile_n=8 -> 3 tiles, 4 valid rows in the last one).
    N2 = 80
    stacked2 = make_stack(kx, N2, offset=100)
    out2 = jax.block_until_ready(
        message_passing_attention(attention_weights, stacked2, force_grid=True,
                                  max_block_bytes=num_layers * 8 * 128 * 4))
    ref2 = reference(attention_weights, stacked2)
    assert out2.shape == (N2, feature_dim)
    assert jnp.allclose(out2, ref2, atol=1e-5, rtol=1e-5)

    # Path 3: tiled path without lane collapse (N not a multiple of 128/F),
    # ragged last tile again (Nc=50, tile_n=16 -> 4 tiles, 2 valid rows in last).
    N3 = 50
    stacked3 = make_stack(kx, N3, offset=200)
    out3 = jax.block_until_ready(
        message_passing_attention(attention_weights, stacked3, force_grid=True,
                                  max_block_bytes=num_layers * 16 * 32 * 4))
    ref3 = reference(attention_weights, stacked3)
    assert out3.shape == (N3, feature_dim)
    assert jnp.allclose(out3, ref3, atol=1e-5, rtol=1e-5)

    print("KERNEL_OK")
</pallas_src>

<mosaic_0001>
module attributes {stable_mosaic.version = 11 : i64} {
  func.func @_gridless_kernel(%arg0: memref<4x128xf32, #tpu.memory_space<vmem>>, %arg1: memref<4x4x128xf32, #tpu.memory_space<vmem>>, %arg2: memref<4x128xf32, #tpu.memory_space<vmem>>) attributes {dimension_semantics = [], scalar_prefetch = 0 : i64, scratch_operands = 0 : i64, tpu.core_type = #tpu.core_type<tc>} {
    %c0 = arith.constant 0 : index
    %c0_0 = arith.constant 0 : index
    %0 = vector.load %arg0[%c0, %c0_0] : memref<4x128xf32, #tpu.memory_space<vmem>>, vector<4x128xf32>
    %c0_1 = arith.constant 0 : index
    %c0_2 = arith.constant 0 : index
    %c0_3 = arith.constant 0 : index
    %1 = vector.load %arg1[%c0_1, %c0_2, %c0_3] : memref<4x4x128xf32, #tpu.memory_space<vmem>>, vector<1x4x128xf32>
    %2 = vector.shape_cast %1 : vector<1x4x128xf32> to vector<4x128xf32>
    %cst = arith.constant dense<0.000000e+00> : vector<128xf32>
    %3 = vector.multi_reduction <add>, %2, %cst [0] : vector<4x128xf32> to vector<128xf32>
    %4 = vector.shape_cast %3 : vector<128xf32> to vector<1x128xf32>
    %5 = vector.extract_strided_slice %0 {offsets = [0, 0], sizes = [1, 128], strides = [1, 1]} : vector<4x128xf32> to vector<1x128xf32>
    %6 = arith.mulf %5, %4 : vector<1x128xf32>
    %cst_4 = arith.constant dense<0.000000e+00> : vector<1xf32>
    %7 = vector.multi_reduction <add>, %6, %cst_4 [1] : vector<1x128xf32> to vector<1xf32>
    %8 = vector.shape_cast %7 : vector<1xf32> to vector<1x1xf32>
    %cst_5 = arith.constant 6.250000e-02 : f32
    %9 = vector.broadcast %cst_5 : f32 to vector<1x1xf32>
    %10 = arith.mulf %8, %9 : vector<1x1xf32>
    %c1 = arith.constant 1 : index
    %c0_6 = arith.constant 0 : index
    %c0_7 = arith.constant 0 : index
    %11 = vector.load %arg1[%c1, %c0_6, %c0_7] : memref<4x4x128xf32, #tpu.memory_space<vmem>>, vector<1x4x128xf32>
    %12 = vector.shape_cast %11 : vector<1x4x128xf32> to vector<4x128xf32>
    %cst_8 = arith.constant dense<0.000000e+00> : vector<128xf32>
    %13 = vector.multi_reduction <add>, %12, %cst_8 [0] : vector<4x128xf32> to vector<128xf32>
    %14 = vector.shape_cast %13 : vector<128xf32> to vector<1x128xf32>
    %15 = vector.extract_strided_slice %0 {offsets = [1, 0], sizes = [1, 128], strides = [1, 1]} : vector<4x128xf32> to vector<1x128xf32>
    %16 = arith.mulf %15, %14 : vector<1x128xf32>
    %cst_9 = arith.constant dense<0.000000e+00> : vector<1xf32>
    %17 = vector.multi_reduction <add>, %16, %cst_9 [1] : vector<1x128xf32> to vector<1xf32>
    %18 = vector.shape_cast %17 : vector<1xf32> to vector<1x1xf32>
    %cst_10 = arith.constant 6.250000e-02 : f32
    %19 = vector.broadcast %cst_10 : f32 to vector<1x1xf32>
    %20 = arith.mulf %18, %19 : vector<1x1xf32>
    %c2 = arith.constant 2 : index
    %c0_11 = arith.constant 0 : index
    %c0_12 = arith.constant 0 : index
    %21 = vector.load %arg1[%c2, %c0_11, %c0_12] : memref<4x4x128xf32, #tpu.memory_space<vmem>>, vector<1x4x128xf32>
    %22 = vector.shape_cast %21 : vector<1x4x128xf32> to vector<4x128xf32>
    %cst_13 = arith.constant dense<0.000000e+00> : vector<128xf32>
    %23 = vector.multi_reduction <add>, %22, %cst_13 [0] : vector<4x128xf32> to vector<128xf32>
    %24 = vector.shape_cast %23 : vector<128xf32> to vector<1x128xf32>
    %25 = vector.extract_strided_slice %0 {offsets = [2, 0], sizes = [1, 128], strides = [1, 1]} : vector<4x128xf32> to vector<1x128xf32>
    %26 = arith.mulf %25, %24 : vector<1x128xf32>
    %cst_14 = arith.constant dense<0.000000e+00> : vector<1xf32>
    %27 = vector.multi_reduction <add>, %26, %cst_14 [1] : vector<1x128xf32> to vector<1xf32>
    %28 = vector.shape_cast %27 : vector<1xf32> to vector<1x1xf32>
    %cst_15 = arith.constant 6.250000e-02 : f32
    %29 = vector.broadcast %cst_15 : f32 to vector<1x1xf32>
    %30 = arith.mulf %28, %29 : vector<1x1xf32>
    %c3 = arith.constant 3 : index
    %c0_16 = arith.constant 0 : index
    %c0_17 = arith.constant 0 : index
    %31 = vector.load %arg1[%c3, %c0_16, %c0_17] : memref<4x4x128xf32, #tpu.memory_space<vmem>>, vector<1x4x128xf32>
    %32 = vector.shape_cast %31 : vector<1x4x128xf32> to vector<4x128xf32>
    %cst_18 = arith.constant dense<0.000000e+00> : vector<128xf32>
    %33 = vector.multi_reduction <add>, %32, %cst_18 [0] : vector<4x128xf32> to vector<128xf32>
    %34 = vector.shape_cast %33 : vector<128xf32> to vector<1x128xf32>
    %35 = vector.extract_strided_slice %0 {offsets = [3, 0], sizes = [1, 128], strides = [1, 1]} : vector<4x128xf32> to vector<1x128xf32>
    %36 = arith.mulf %35, %34 : vector<1x128xf32>
    %cst_19 = arith.constant dense<0.000000e+00> : vector<1xf32>
    %37 = vector.multi_reduction <add>, %36, %cst_19 [1] : vector<1x128xf32> to vector<1xf32>
    %38 = vector.shape_cast %37 : vector<1xf32> to vector<1x1xf32>
    %cst_20 = arith.constant 6.250000e-02 : f32
    %39 = vector.broadcast %cst_20 : f32 to vector<1x1xf32>
    %40 = arith.mulf %38, %39 : vector<1x1xf32>
    %41 = arith.maximumf %10, %20 : vector<1x1xf32>
    %42 = arith.maximumf %41, %30 : vector<1x1xf32>
    %43 = arith.maximumf %42, %40 : vector<1x1xf32>
    %44 = arith.subf %10, %43 : vector<1x1xf32>
    %45 = math.exp %44 : vector<1x1xf32>
    %46 = arith.subf %20, %43 : vector<1x1xf32>
    %47 = math.exp %46 : vector<1x1xf32>
    %48 = arith.subf %30, %43 : vector<1x1xf32>
    %49 = math.exp %48 : vector<1x1xf32>
    %50 = arith.subf %40, %43 : vector<1x1xf32>
    %51 = math.exp %50 : vector<1x1xf32>
    %52 = arith.addf %45, %47 : vector<1x1xf32>
    %53 = arith.addf %52, %49 : vector<1x1xf32>
    %54 = arith.addf %53, %51 : vector<1x1xf32>
    %cst_21 = arith.constant 1.000000e+00 : f32
    %55 = vector.broadcast %cst_21 : f32 to vector<1x1xf32>
    %56 = arith.divf %55, %54 : vector<1x1xf32>
    %c0_22 = arith.constant 0 : index
    %c0_23 = arith.constant 0 : index
    %c0_24 = arith.constant 0 : index
    %57 = vector.load %arg1[%c0_22, %c0_23, %c0_24] : memref<4x4x128xf32, #tpu.memory_space<vmem>>, vector<1x4x128xf32>
    %58 = vector.shape_cast %57 : vector<1x4x128xf32> to vector<4x128xf32>
    %59 = arith.mulf %45, %56 : vector<1x1xf32>
    %60 = vector.broadcast %59 : vector<1x1xf32> to vector<4x128xf32>
    %61 = arith.mulf %58, %60 : vector<4x128xf32>
    %c1_25 = arith.constant 1 : index
    %c0_26 = arith.constant 0 : index
    %c0_27 = arith.constant 0 : index
    %62 = vector.load %arg1[%c1_25, %c0_26, %c0_27] : memref<4x4x128xf32, #tpu.memory_space<vmem>>, vector<1x4x128xf32>
    %63 = vector.shape_cast %62 : vector<1x4x128xf32> to vector<4x128xf32>
    %64 = arith.mulf %47, %56 : vector<1x1xf32>
    %65 = vector.broadcast %64 : vector<1x1xf32> to vector<4x128xf32>
    %66 = arith.mulf %63, %65 : vector<4x128xf32>
    %67 = arith.addf %61, %66 : vector<4x128xf32>
    %c2_28 = arith.constant 2 : index
    %c0_29 = arith.constant 0 : index
    %c0_30 = arith.constant 0 : index
    %68 = vector.load %arg1[%c2_28, %c0_29, %c0_30] : memref<4x4x128xf32, #tpu.memory_space<vmem>>, vector<1x4x128xf32>
    %69 = vector.shape_cast %68 : vector<1x4x128xf32> to vector<4x128xf32>
    %70 = arith.mulf %49, %56 : vector<1x1xf32>
    %71 = vector.broadcast %70 : vector<1x1xf32> to vector<4x128xf32>
    %72 = arith.mulf %69, %71 : vector<4x128xf32>
    %73 = arith.addf %67, %72 : vector<4x128xf32>
    %c3_31 = arith.constant 3 : index
    %c0_32 = arith.constant 0 : index
    %c0_33 = arith.constant 0 : index
    %74 = vector.load %arg1[%c3_31, %c0_32, %c0_33] : memref<4x4x128xf32, #tpu.memory_space<vmem>>, vector<1x4x128xf32>
    %75 = vector.shape_cast %74 : vector<1x4x128xf32> to vector<4x128xf32>
    %76 = arith.mulf %51, %56 : vector<1x1xf32>
    %77 = vector.broadcast %76 : vector<1x1xf32> to vector<4x128xf32>
    %78 = arith.mulf %75, %77 : vector<4x128xf32>
    %79 = arith.addf %73, %78 : vector<4x128xf32>
    %c0_34 = arith.constant 0 : index
    %c0_35 = arith.constant 0 : index
    %80 = vector.load %arg2[%c0_34, %c0_35] : memref<4x128xf32, #tpu.memory_space<vmem>>, vector<4x128xf32>
    tpu.vector_store %arg2[%c0_34, %c0_35], %79 {strides = array<i32>} : memref<4x128xf32, #tpu.memory_space<vmem>>, vector<4x128xf32>,
    return
  }
}

</mosaic_0001>

<bundles_post_ra>
// kernel: tpu_custom_call.1
= control target key start
LH: loop header
LB: loop body
LE: loop exit
PB: predicated region body
PF: predicated region fallthrough
CT: control target
= control target key end

     0   :  { %7 = vsyncpa [#allocation3], 0  ;;  %s363_s0 = inlined_call_operand.hbm [shape: f32[4,128], index: 0, kind: input, shape index: {}]   ;;  %s364_s1 = inlined_call_operand.hbm [shape: f32[4,4,128], index: 1, kind: input, shape index: {}]   ;;  %s365_s2 = inlined_call_operand.hbm [shape: f32[4,128], index: 2, kind: output, shape index: {}]  }
   0x1   :  { %8 = vsyncpa [#allocation6], 0 }
   0x2   :  { %9 = vsyncpa [#allocation4], 0  ;;  %s15_s11 = sshll.u32 %s363_s0, 4  ;;  %s318_s12 = smov [#allocation2]   ;;  %s16_s11 = int_to_ptr.hbm [resolvable:$true] %s15_s11 }
   0x3   :  { %s17_s13 = sshll.u32 %s318_s12, 4  ;;  %s25_s16 = sshll.u32 %s364_s1, 4  ;;  %s18_s13 = int_to_ptr.vmem [resolvable:$true] %s17_s13  ;;  %s26_s16 = int_to_ptr.hbm [resolvable:$true] %s25_s16 }
   0x4   :  { %20 = dma.hbm_to_vmem [thread:$0]  %s16_s11, 64, %s18_s13, [#allocation3]  }
   0x5   :  { %s319_s17 = smov [#allocation5]   ;;  %s320_s19 = smov 64  }
   0x6   :  { %s27_s18 = sshll.u32 %s319_s17, 4  ;;  %s321_s20 = smov 4   ;;  %s28_s18 = int_to_ptr.vmem [resolvable:$true] %s27_s18 }
   0x7   :  { %33 = dma.hbm_to_vmem [thread:$0]  %s26_s16, 256, %s28_s18, [#allocation6], %s320_s19, %s320_s19, %s321_s20  }
   0x8   :  { %312 = dma.done.wait [#allocation3], 64  }
   0x9   :  { %313 = vsyncadd [#allocation3], 4294967232 }
   0xa   :  { %314 = dma.done.wait [#allocation6], 256  }
   0xb   :  { %315 = vsyncadd [#allocation6], 4294967040  ;;  %vm44_vm0 = vcmask 1043456   ;;  %v344_v0 = vld [vmem:[#allocation5 + $0x4] sm:$0xf]  ;;  %vm68_vm1 = vcmask 1041409  }
   0xc   :  { %v346_v1 = vld [vmem:[#allocation5 + $0x8] sm:$0xf]  ;;  %v60_v2 = vsel %vm44_vm0, %v344_v0, 0.0  ;;  %v350_v4 = vld [vmem:[#allocation5] sm:$0xf]  ;;  %vm83_vm2 = vcmask 1042434  }
   0xd   :  { %v75_v3 = vsel %vm44_vm0, %v346_v1, 0.0  ;;  %v352_v5 = vld [vmem:[#allocation5 + $0xc] sm:$0xf]  ;;  %v61_v6 = vrot.slane %v60_v2, 4  ;;  %v45_v8 = vsel %vm44_vm0, %v350_v4, 0.0  ;;  %vm53_vm3 = vcmask 1040384  }
   0xe   :  { %v76_v7 = vrot.slane %v75_v3, 4  ;;  %v90_v9 = vsel %vm44_vm0, %v352_v5, 0.0  ;;  %v46_v10 = vrot.slane %v45_v8, 4  ;;  %v42_v26 = vld [vmem:[#allocation2] sm:$0xf]  ;;  %vm98_vm4 = vcmask 1043459  }
   0xf   :  { %v91_v11 = vrot.slane %v90_v9, 4  ;;  %v62_v12 = vadd.f32 %v61_v6, %v60_v2  ;;  %s322_s23 = smov [#allocation7]   ;;  %s206_s27 = sshll.u32 %s365_s2, 4  ;;  %s207_s27 = int_to_ptr.hbm [resolvable:$true] %s206_s27 }
  0x10   :  { %v77_v13 = vadd.f32 %v76_v7, %v75_v3  ;;  %v47_v14 = vadd.f32 %v46_v10, %v45_v8  ;;  %s204_s24 = sshll.u32 %s322_s23, 4  ;;  %s205_s24 = int_to_ptr.vmem [resolvable:$true] %s204_s24 }
  0x11   :  { %v92_v15 = vadd.f32 %v91_v11, %v90_v9  ;;  %v63_v16 = vrot.slane %v62_v12, 2 }
  0x12   :  { %v78_v17 = vrot.slane %v77_v13, 2  ;;  %v48_v18 = vrot.slane %v47_v14, 2 }
  0x13   :  { %v93_v19 = vrot.slane %v92_v15, 2  ;;  %v64_v20 = vadd.f32 %v63_v16, %v62_v12 }
  0x14   :  { %v79_v21 = vadd.f32 %v78_v17, %v77_v13  ;;  %v49_v22 = vadd.f32 %v48_v18, %v47_v14 }
  0x15   :  { %v94_v23 = vadd.f32 %v93_v19, %v92_v15  ;;  %v65_v24 = vrot.slane %v64_v20, 1 }
  0x16   :  { %v80_v25 = vrot.slane %v79_v21, 1  ;;  %v50_v27 = vrot.slane %v49_v22, 1 }
  0x17   :  { %v95_v28 = vrot.slane %v94_v23, 1  ;;  %v66_v29 = vadd.f32 %v65_v24, %v64_v20 }
  0x18   :  { %v81_v30 = vadd.f32 %v80_v25, %v79_v21  ;;  %v51_v33 = vadd.f32 %v50_v27, %v49_v22 }
  0x19   :  { %v67_v31 = vmul.f32 %v66_v29, %v42_v26  ;;  %v96_v34 = vadd.f32 %v95_v28, %v94_v23 }
  0x1a   :  { %v82_v32 = vmul.f32 %v81_v30, %v42_v26  ;;  %v52_v37 = vmul.f32 %v51_v33, %v42_v26 }
  0x1b   :  { %v69_v35 = vsel %vm68_vm1, %v67_v31, 0.0  ;;  %v97_v38 = vmul.f32 %v96_v34, %v42_v26 }
  0x1c   :  { %v84_v36 = vsel %vm83_vm2, %v82_v32, 0.0  ;;  %70 = vadd.xlane.f32.xlu0 %v69_v35  ;;  %v54_v39 = vsel %vm53_vm3, %v52_v37, 0.0 }
  0x1d   :  { %85 = vadd.xlane.f32.xlu1 %v84_v36  ;;  %v99_v40 = vsel %vm98_vm4, %v97_v38, 0.0 }
  0x24   :  { %55 = vadd.xlane.f32.xlu0 %v54_v39 }
  0x25   :  { %100 = vadd.xlane.f32.xlu1 %v99_v40 }
  0x8f   :  { %v71_v41 = vpop.xlane.xlu0 %70 }
  0x90   :  { %v86_v42 = vpop.xlane.xlu1 %85  ;;  %v72_v43 = vmul.f32 0.0625, %v71_v41 }
  0x91   :  { %v87_v44 = vmul.f32 0.0625, %v86_v42 }
  0x92   :  { %v104_v47 = vrot.slane %v72_v43, 1 }
  0x93   :  { %v108_v50 = vrot.slane %v87_v44, 2 }
  0x97   :  { %v56_v45 = vpop.xlane.xlu0 %55 }
  0x98   :  { %v101_v46 = vpop.xlane.xlu1 %100  ;;  %v57_v48 = vmul.f32 0.0625, %v56_v45 }
  0x99   :  { %v102_v49 = vmul.f32 0.0625, %v101_v46 }
  0x9a   :  { %v106_v51 = vmax.f32 %v57_v48, %v104_v47 }
  0x9b   :  { %v112_v52 = vrot.slane %v102_v49, 3 }
  0x9c   :  { %v110_v53 = vmax.f32 %v106_v51, %v108_v50 }
  0x9e   :  { %v114_v54 = vmax.f32 %v110_v53, %v112_v52 }
  0xa0   :  { %v119_v55 = vrot.slane %v114_v54, 7  ;;  %v124_v56 = vrot.slane %v114_v54, 6  ;;  %v129_v57 = vrot.slane %v114_v54, 5  ;;  %v115_v58 = vsub.f32 %v57_v48, %v114_v54 }
  0xa2   :  { %v121_v59 = vsub.f32 %v72_v43, %v119_v55  ;;  %v126_v60 = vsub.f32 %v87_v44, %v124_v56  ;;  %v131_v61 = vsub.f32 %v102_v49, %v129_v57  ;;  %v116_v62 = vmul.f32 1.442695, %v115_v58 }
  0xa4   :  { %v122_v63 = vmul.f32 1.442695, %v121_v59  ;;  %v127_v2 = vmul.f32 1.442695, %v126_v60  ;;  %v132_v3 = vmul.f32 1.442695, %v131_v61  ;;  %230 = vpow2.f32 %v116_v62 }
  0xa6   :  { %232 = vpow2.f32 %v122_v63 }
  0xa7   :  { %234 = vpow2.f32 %v127_v2 }
  0xa8   :  { %236 = vpow2.f32 %v132_v3 }
  0xaa   :  { %v231_v6 = vpop.eup %230 }
  0xac   :  { %v233_v7 = vpop.eup %232 }
  0xad   :  { %v235_v8 = vpop.eup %234  ;;  %v135_v9 = vrot.slane %v233_v7, 1 }
  0xae   :  { %v237_v10 = vpop.eup %236  ;;  %v139_v12 = vrot.slane %v235_v8, 2 }
  0xaf   :  { %v137_v11 = vadd.f32 %v231_v6, %v135_v9  ;;  %v143_v13 = vrot.slane %v237_v10, 3 }
  0xb1   :  { %v141_v14 = vadd.f32 %v139_v12, %v137_v11 }
  0xb3   :  { %v145_v15 = vadd.f32 %v143_v13, %v141_v14 }
  0xb5   :  { %238 = vrcp.f32 %v145_v15  ;;  %v157_v19 = vand.u32 2147483648, %v145_v15  ;;  %v155_v21 = vand.u32 2147483647, %v145_v15  ;;  %vm151_vm6 = vweird.f32 %v145_v15 }
  0xb7   :  { %v158_v23 = vor.u32 1.1754944e-38, %v157_v19  ;;  %vm156_vm8 = vcmp.eq.f32.partialorder %v155_v21, 8.507059e+37 }
  0xbb   :  { %v239_v16 = vpop.eup %238 }
  0xbc   :  { %v147_v17 = vmul.f32 %v239_v16, %v145_v15  ;;  %vm152_vm5 = vweird.f32 %v239_v16 }
  0xbd   :  { %vm153_vm7 = vmor %vm151_vm6, %vm152_vm5 }
  0xbe   :  { %v148_v18 = vsub.f32 1.0, %v147_v17 }
  0xc0   :  { %v149_v20 = vmul.f32 %v239_v16, %v148_v18 }
  0xc2   :  { %v150_v22 = vadd.f32 %v239_v16, %v149_v20 }
  0xc4   :  { %v154_v24 = vsel %vm153_vm7, %v239_v16, %v150_v22 }
  0xc5   :  { %v159_v25 = vsel %vm156_vm8, %v158_v23, %v154_v24 }
  0xc6   :  { %v161_v26 = vmul.f32 %v231_v6, %v159_v25  ;;  %v168_v27 = vrot.slane %v159_v25, 7  ;;  %v178_v28 = vrot.slane %v159_v25, 6  ;;  %v188_v29 = vrot.slane %v159_v25, 5 }
  0xc8   :  { %217 = vpush %v161_v26  ;;  %v170_v30 = vmul.f32 %v233_v7, %v168_v27  ;;  %v180_v31 = vmul.f32 %v235_v8, %v178_v28  ;;  %v190_v32 = vmul.f32 %v237_v10, %v188_v29 }
  0xca   :  { %v172_v33 = vrot.slane %v170_v30, 1  ;;  %v182_v34 = vrot.slane %v180_v31, 2  ;;  %v192_v35 = vrot.slane %v190_v32, 3 }
  0xcc   :  { %219 = vpush %v172_v33 }
  0xcd   :  { %221 = vpush %v182_v34 }
  0xce   :  { %223 = vpush %v192_v35 }
  0xf9   :  { %s218_s0 = spop %217 }
  0xfa   :  { %v164_v36 = vstv %s218_s0 }
  0xfb   :  { %v166_v38 = vmul.f32 %v164_v36, %v350_v4 }
  0xfd   :  { %s220_s1 = spop %219 }
  0xfe   :  { %v174_v37 = vstv %s220_s1  ;;  %s222_s21 = spop %221 }
  0xff   :  { %v176_v39 = vmul.f32 %v174_v37, %v344_v0  ;;  %v184_v40 = vstv %s222_s21  ;;  %s224_s22 = spop %223 }
 0x100   :  { %v194_v41 = vstv %s224_s22  ;;  %v186_v43 = vmul.f32 %v184_v40, %v346_v1 }
 0x101   :  { %v177_v42 = vadd.f32 %v176_v39, %v166_v38  ;;  %v196_v45 = vmul.f32 %v194_v41, %v352_v5 }
 0x103   :  { %v187_v44 = vadd.f32 %v186_v43, %v177_v42 }
 0x105   :  { %v197_v46 = vadd.f32 %v196_v45, %v187_v44 }
 0x107   :  { %198 = vst [vmem:[#allocation7] sm:$0xf] %v197_v46 }
 0x108   :  { %209 = dma.vmem_to_hbm [thread:$0]  %s205_s24, 64, %s207_s27, [#allocation4]  }
 0x109   :  { %316 = dma.done.wait [#allocation4], 64  }
 0x10a   :  { %317 = vsyncadd [#allocation4], 4294967232 }
 0x10b   :  { %214 = vsyncpa [#allocation3], 1 }
 0x10c   :  { %215 = vsyncpa [#allocation6], 1 }
 0x10d   :  { %216 = vsyncpa [#allocation4], 1 }

</bundles_post_ra>
